<compile_context>
chip_gen: v7x
topology: tpu7x:2x2x1
jax: 0.10.0
libtpu: 0.0.40
codegen_flags: <defaults>
</compile_context>

<pallas_src>
import math

import jax
import jax.numpy as jnp
from jax.experimental import pallas as pl
from jax.experimental.pallas import tpu as pltpu


def _round_up(x, m):
    return ((x + m - 1) // m) * m


def _pick_tile(padded_dim, max_tile):
    """Largest power-of-two multiple of 128 (<= max_tile) dividing padded_dim."""
    t = max_tile
    while t > 128 and padded_dim % t != 0:
        t //= 2
    return t


def _bnn_linear_kernel(x_ref, w_ref, b_ref, o_ref, acc_ref):
    """One grid step = (sample s, output tile n, reduction tile k).

    Block shapes:
      x_ref  : (1, Bp, TK)  bf16   (constant block index when x is shared)
      w_ref  : (1, TK, TN)  bf16   weights laid out as (S, D_in, D_out)
      b_ref  : (1, 1, TN)   f32
      o_ref  : (1, Bp, TN)  f32
      acc_ref: (Bp, TN)     f32 VMEM accumulator (resident across K axis)
    """
    k = pl.program_id(2)

    @pl.when(k == 0)
    def _():
        acc_ref[...] = jnp.zeros_like(acc_ref)

    # Straight x @ w feeds the MXU directly (no in-kernel transpose).
    acc_ref[...] += jnp.dot(x_ref[0], w_ref[0],
                            preferred_element_type=jnp.float32)

    @pl.when(k == pl.num_programs(2) - 1)
    def _():
        o_ref[0] = (acc_ref[...] + b_ref[0]).astype(o_ref.dtype)


def bnn_linear_pallas(x, w, b, *, shared_x):
    """Per-sample linear layer.

    x: (Sx, B, D_in) with Sx == 1 if `shared_x` else Sx == S
    w: (S, D_in, D_out)
    b: (S, 1, D_out)
    returns: (S, B, D_out) float32
    """
    Sx, B, D_in = x.shape
    S, _, D_out = w.shape

    Bp = _round_up(B, 8)
    Kp = _round_up(D_in, 128)
    Np = _round_up(D_out, 128)

    # Lane/sublane-dense padding; bf16 inputs, f32 bias/accumulator/output.
    x_p = jnp.pad(x, ((0, 0), (0, Bp - B), (0, Kp - D_in))).astype(jnp.bfloat16)
    w_p = jnp.pad(w, ((0, 0), (0, Kp - D_in), (0, Np - D_out))).astype(jnp.bfloat16)
    b_p = jnp.pad(b, ((0, 0), (0, 0), (0, Np - D_out))).astype(jnp.float32)

    TK = _pick_tile(Kp, 512)
    TN = _pick_tile(Np, 512)

    if shared_x:
        # Single shared input block: constant block index keeps x resident in
        # VMEM across the whole grid (no S-way HBM broadcast traffic).
        x_index = lambda s, n, k: (0, 0, k)
    else:
        x_index = lambda s, n, k: (s, 0, k)

    flops = 2 * S * Bp * Kp * Np
    bytes_accessed = (x_p.size * 2 + w_p.size * 2 + b_p.size * 4
                      + S * Bp * Np * 4)

    out = pl.pallas_call(
        _bnn_linear_kernel,
        out_shape=jax.ShapeDtypeStruct((S, Bp, Np), jnp.float32),
        grid_spec=pltpu.PrefetchScalarGridSpec(
            num_scalar_prefetch=0,
            grid=(S, Np // TN, Kp // TK),
            in_specs=[
                pl.BlockSpec((1, Bp, TK), x_index),
                pl.BlockSpec((1, TK, TN), lambda s, n, k: (s, k, n)),
                pl.BlockSpec((1, 1, TN), lambda s, n, k: (s, 0, n)),
            ],
            out_specs=pl.BlockSpec((1, Bp, TN), lambda s, n, k: (s, 0, n)),
            scratch_shapes=[pltpu.VMEM((Bp, TN), jnp.float32)],
        ),
        compiler_params=pltpu.CompilerParams(
            dimension_semantics=("parallel", "parallel", "arbitrary")),
        cost_estimate=pl.CostEstimate(
            flops=flops, transcendentals=0, bytes_accessed=bytes_accessed),
    )(x_p, w_p, b_p)

    return out[:, :B, :D_out]


class BNNLinearModule:
    """Concrete BNNModule (Bayesian linear layer) with muP-style initialization."""

    def __init__(self, in_features, out_features, key):
        self.in_features = in_features
        self.out_features = out_features
        fan_in = in_features
        k_mean, k_bias = jax.random.split(key)
        # reset_parameters_of_torch_module: normal_(mean=0, std=weight_init_scale)
        # MaximalUpdate hidden-layer init scale: 1/sqrt(fan_in)
        w_std = 1.0 / math.sqrt(fan_in)
        self.weight_mean = w_std * jax.random.normal(
            k_mean, (out_features, in_features), jnp.float32)
        self.bias_mean = w_std * jax.random.normal(
            k_bias, (out_features,), jnp.float32)
        # Fixed (log-)scale of the variational posterior (softplus parameterized).
        self.weight_rho = jnp.full((out_features, in_features), -3.0, jnp.float32)
        self.bias_rho = jnp.full((out_features,), -3.0, jnp.float32)

    def sample_parameters(self, key, sample_shape):
        """Draw per-sample weights/biases: theta_s = mean + softplus(rho) * eps_s."""
        S = 1
        for d in sample_shape:
            S *= int(d)
        S = max(S, 1)
        kw, kb = jax.random.split(key)
        w_eps = jax.random.normal(kw, (S,) + self.weight_mean.shape, jnp.float32)
        b_eps = jax.random.normal(kb, (S,) + self.bias_mean.shape, jnp.float32)
        w_sigma = jax.nn.softplus(self.weight_rho)
        b_sigma = jax.nn.softplus(self.bias_rho)
        w_samples = self.weight_mean[None] + w_sigma[None] * w_eps   # (S, D_out, D_in)
        b_samples = self.bias_mean[None] + b_sigma[None] * b_eps     # (S, D_out)
        return {"weight": w_samples, "bias": b_samples}

    def forward(self, x, sample_shape=(), key=None,
                input_contains_samples=False, parameter_samples=None):
        """BNNModule.forward contract.

        x: [*sample, batch, in_features] if input_contains_samples else
           [batch, in_features]
        returns: [*sample, batch, out_features]
        """
        squeeze = len(sample_shape) == 0
        eff_sample_shape = (1,) if squeeze else tuple(sample_shape)
        S = 1
        for d in eff_sample_shape:
            S *= int(d)

        if parameter_samples is None:
            if key is None:
                key = jax.random.PRNGKey(0)
            parameter_samples = self.sample_parameters(key, eff_sample_shape)

        # (S, D_out, D_in) torch-style layout -> (S, D_in, D_out) so the kernel
        # can feed the MXU with a straight x @ w (no in-kernel transpose).
        w_samples = parameter_samples["weight"].reshape(
            (S, self.out_features, self.in_features))
        w_samples = jnp.swapaxes(w_samples, 1, 2)
        b_samples = parameter_samples["bias"].reshape((S, 1, self.out_features))

        if input_contains_samples:
            x_samples = x.reshape((S,) + x.shape[len(sample_shape):])
            shared_x = False
        else:
            # Single input shared across sample dims; NOT materialized S times.
            x_samples = x[None]
            shared_x = True

        out = bnn_linear_pallas(x_samples, w_samples, b_samples,
                                shared_x=shared_x)  # (S, B, D_out) f32

        if squeeze:
            return out[0]
        return out.reshape(tuple(sample_shape) + out.shape[1:])


def _reference(x_samples_or_x, params, shared_x):
    """Pure-JAX reference with the same bf16-input / f32-accumulate numerics."""
    w = params["weight"].astype(jnp.bfloat16)          # (S, D_out, D_in)
    b = params["bias"].astype(jnp.float32)             # (S, D_out)
    if shared_x:
        xb = x_samples_or_x.astype(jnp.bfloat16)       # (B, D_in)
        out = jnp.einsum("bi,soi->sbo", xb, w,
                         preferred_element_type=jnp.float32)
    else:
        xb = x_samples_or_x.astype(jnp.bfloat16)       # (S, B, D_in)
        out = jnp.einsum("sbi,soi->sbo", xb, w,
                         preferred_element_type=jnp.float32)
    return out + b[:, None, :]


if __name__ == "__main__":
    key = jax.random.PRNGKey(0)
    k_param, k_input, k_sample, k_param2, k_input2, k_sample2, k_x3 = (
        jax.random.split(key, 7))

    # --- Test 1: lane-aligned shapes, shared input, sample_shape=(2,) --------
    batch, in_features, out_features = 8, 256, 256
    sample_shape = (2,)
    module = BNNLinearModule(in_features, out_features, k_param)
    x = jax.random.normal(k_input, (batch, in_features), jnp.float32)
    params = module.sample_parameters(k_sample, sample_shape)

    out = module.forward(x, sample_shape=sample_shape,
                         parameter_samples=params,
                         input_contains_samples=False)
    out = jax.block_until_ready(out)
    assert out.shape == sample_shape + (batch, out_features), out.shape
    ref = _reference(x, params, shared_x=True)
    assert jnp.allclose(out, ref, atol=1e-2, rtol=1e-2)

    # --- Test 2: input already contains samples ------------------------------
    x3 = jax.random.normal(k_x3, sample_shape + (batch, in_features), jnp.float32)
    out3 = module.forward(x3, sample_shape=sample_shape,
                          parameter_samples=params,
                          input_contains_samples=True)
    out3 = jax.block_until_ready(out3)
    assert out3.shape == sample_shape + (batch, out_features), out3.shape
    ref3 = _reference(x3, params, shared_x=False)
    assert jnp.allclose(out3, ref3, atol=1e-2, rtol=1e-2)

    # --- Test 3: non-aligned shapes (padding path), empty sample_shape -------
    batch2, in2, out2_f = 5, 48, 24
    module2 = BNNLinearModule(in2, out2_f, k_param2)
    x2 = jax.random.normal(k_input2, (batch2, in2), jnp.float32)
    params2 = module2.sample_parameters(k_sample2, (1,))
    out2 = module2.forward(x2, sample_shape=(), parameter_samples=params2,
                           input_contains_samples=False)
    out2 = jax.block_until_ready(out2)
    assert out2.shape == (batch2, out2_f), out2.shape
    ref2 = _reference(x2, params2, shared_x=True)[0]
    assert jnp.allclose(out2, ref2, atol=1e-2, rtol=1e-2)

    print("KERNEL_OK")
</pallas_src>

<mosaic_0001>
module attributes {stable_mosaic.version = 11 : i64} {
  func.func @_bnn_linear_kernel(%arg0: i32, %arg1: i32, %arg2: i32, %arg3: memref<1x8x256xbf16, #tpu.memory_space<vmem>>, %arg4: memref<1x256x256xbf16, #tpu.memory_space<vmem>>, %arg5: memref<1x1x256xf32, #tpu.memory_space<vmem>>, %arg6: memref<1x8x256xf32, #tpu.memory_space<vmem>>, %arg7: memref<8x256xf32, #tpu.memory_space<vmem>>) attributes {dimension_semantics = [#tpu.dimension_semantics<parallel>, #tpu.dimension_semantics<parallel>, #tpu.dimension_semantics<arbitrary>], iteration_bounds = array<i64: 2, 1, 1>, scalar_prefetch = 0 : i64, scratch_operands = 1 : i64, tpu.core_type = #tpu.core_type<tc>, window_params = [{transform_indices = @transform_0, window_bounds = array<i64: 1, 8, 256>}, {transform_indices = @transform_1, window_bounds = array<i64: 1, 256, 256>}, {transform_indices = @transform_2, window_bounds = array<i64: 1, 1, 256>}, {transform_indices = @transform_3, window_bounds = array<i64: 1, 8, 256>}]} {
    %c0_i32 = arith.constant 0 : i32
    %0 = arith.cmpi eq, %arg2, %c0_i32 : i32
    %1 = arith.extui %0 : i1 to i32
    %c0_i32_0 = arith.constant 0 : i32
    %2 = arith.cmpi ne, %1, %c0_i32_0 : i32
    scf.if %2 {
      %cst_12 = arith.constant 0.000000e+00 : f32
      %14 = vector.broadcast %cst_12 : f32 to vector<8x256xf32>
      %c0_13 = arith.constant 0 : index
      %c0_14 = arith.constant 0 : index
      %15 = vector.load %arg7[%c0_13, %c0_14] : memref<8x256xf32, #tpu.memory_space<vmem>>, vector<8x256xf32>
      tpu.vector_store %arg7[%c0_13, %c0_14], %14 {strides = array<i32>} : memref<8x256xf32, #tpu.memory_space<vmem>>, vector<8x256xf32>,
    } else {
    }
    %c0 = arith.constant 0 : index
    %c0_1 = arith.constant 0 : index
    %3 = vector.load %arg7[%c0, %c0_1] : memref<8x256xf32, #tpu.memory_space<vmem>>, vector<8x256xf32>
    %c0_2 = arith.constant 0 : index
    %c0_3 = arith.constant 0 : index
    %c0_4 = arith.constant 0 : index
    %4 = vector.load %arg3[%c0_2, %c0_3, %c0_4] : memref<1x8x256xbf16, #tpu.memory_space<vmem>>, vector<1x8x256xbf16>
    %5 = vector.shape_cast %4 : vector<1x8x256xbf16> to vector<8x256xbf16>
    %c0_5 = arith.constant 0 : index
    %c0_6 = arith.constant 0 : index
    %c0_7 = arith.constant 0 : index
    %6 = vector.load %arg4[%c0_5, %c0_6, %c0_7] : memref<1x256x256xbf16, #tpu.memory_space<vmem>>, vector<1x256x256xbf16>
    %7 = vector.shape_cast %6 : vector<1x256x256xbf16> to vector<256x256xbf16>
    %cst = arith.constant dense<0.000000e+00> : vector<8x256xf32>
    %8 = tpu.matmul %5, %7, %cst {dimension_numbers = #tpu.dot_dimension_numbers<[1], [0], [0], [1], [0, 0, 1, 1], [], []>} : vector<8x256xbf16>, vector<256x256xbf16>, vector<8x256xf32> -> vector<8x256xf32>
    %9 = arith.addf %3, %8 : vector<8x256xf32>
    %c0_8 = arith.constant 0 : index
    %c0_9 = arith.constant 0 : index
    %10 = vector.load %arg7[%c0_8, %c0_9] : memref<8x256xf32, #tpu.memory_space<vmem>>, vector<8x256xf32>
    tpu.vector_store %arg7[%c0_8, %c0_9], %9 {strides = array<i32>} : memref<8x256xf32, #tpu.memory_space<vmem>>, vector<8x256xf32>,
    %c0_i32_10 = arith.constant 0 : i32
    %11 = arith.cmpi eq, %arg2, %c0_i32_10 : i32
    %12 = arith.extui %11 : i1 to i32
    %c0_i32_11 = arith.constant 0 : i32
    %13 = arith.cmpi ne, %12, %c0_i32_11 : i32
    scf.if %13 {
      %c0_12 = arith.constant 0 : index
      %c0_13 = arith.constant 0 : index
      %14 = vector.load %arg7[%c0_12, %c0_13] : memref<8x256xf32, #tpu.memory_space<vmem>>, vector<8x256xf32>
      %c0_14 = arith.constant 0 : index
      %c0_15 = arith.constant 0 : index
      %c0_16 = arith.constant 0 : index
      %15 = vector.load %arg5[%c0_14, %c0_15, %c0_16] : memref<1x1x256xf32, #tpu.memory_space<vmem>>, vector<1x1x256xf32>
      %16 = vector.shape_cast %15 : vector<1x1x256xf32> to vector<1x256xf32>
      %17 = vector.broadcast %16 : vector<1x256xf32> to vector<8x256xf32>
      %18 = arith.addf %14, %17 : vector<8x256xf32>
      %c0_17 = arith.constant 0 : index
      %c0_18 = arith.constant 0 : index
      %c0_19 = arith.constant 0 : index
      %19 = vector.load %arg6[%c0_17, %c0_18, %c0_19] : memref<1x8x256xf32, #tpu.memory_space<vmem>>, vector<1x8x256xf32>
      %20 = vector.shape_cast %19 : vector<1x8x256xf32> to vector<8x256xf32>
      %21 = vector.shape_cast %18 : vector<8x256xf32> to vector<1x8x256xf32>
      tpu.vector_store %arg6[%c0_17, %c0_18, %c0_19], %21 {strides = array<i32>} : memref<1x8x256xf32, #tpu.memory_space<vmem>>, vector<1x8x256xf32>,
    } else {
    }
    return
  }
  func.func @transform_0(%arg0: i32, %arg1: i32, %arg2: i32) -> (i32, i32, i32) {
    %c0_i32 = arith.constant 0 : i32
    %c0_i32_0 = arith.constant 0 : i32
    %c0_i32_1 = arith.constant 0 : i32
    return %c0_i32, %c0_i32_0, %arg2 : i32, i32, i32
  }
  func.func @transform_1(%arg0: i32, %arg1: i32, %arg2: i32) -> (i32, i32, i32) {
    %c0_i32 = arith.constant 0 : i32
    return %arg0, %arg2, %arg1 : i32, i32, i32
  }
  func.func @transform_2(%arg0: i32, %arg1: i32, %arg2: i32) -> (i32, i32, i32) {
    %c0_i32 = arith.constant 0 : i32
    %c0_i32_0 = arith.constant 0 : i32
    return %arg0, %c0_i32, %arg1 : i32, i32, i32
  }
  func.func @transform_3(%arg0: i32, %arg1: i32, %arg2: i32) -> (i32, i32, i32) {
    %c0_i32 = arith.constant 0 : i32
    %c0_i32_0 = arith.constant 0 : i32
    return %arg0, %c0_i32, %arg1 : i32, i32, i32
  }
}

</mosaic_0001>

<bundles_post_ra>
// kernel: tpu_custom_call.1
= control target key start
LH: loop header
LB: loop body
LE: loop exit
PB: predicated region body
PF: predicated region fallthrough
CT: control target
= control target key end

     0   :  { %8 = vsyncpa [#allocation4], 0  ;;  %s1295_s0 = inlined_call_operand.hbm [shape: bf16[1,8,256], index: 0, kind: input, shape index: {}]   ;;  %s1296_s1 = inlined_call_operand.hbm [shape: bf16[2,256,256], index: 1, kind: input, shape index: {}]   ;;  %s1297_s2 = inlined_call_operand.vmem [shape: f32[2,1,256], index: 2, kind: input, shape index: {}]   ;;  %s1298_s3 = inlined_call_operand.hbm [shape: f32[2,8,256], index: 3, kind: output, shape index: {}]  }
   0x1   :  { %9 = vsyncpa [#allocation7], 0 }
   0x2   :  { %11 = vsyncpa [#allocation7 + $0x1], 0 }
   0x3   :  { %12 = vsyncpa [#allocation5], 0 }
   0x4   :  { %14 = vsyncpa [#allocation5 + $0x1], 0  ;;  %s1036_s12 = smov 0   ;;  %s1038_s13 = smov 0  }
   0x5   :  { %s1040_s14 = smov 0   ;;  %s1042_s15 = smov 0  }
   0x6   :  { %s1044_s16 = smov 0   ;;  %s1046_s17 = smov 0  }
   0x7 LB: > { %s686_s18 = sadd.s32 4294967295, %s1009_s17   ;;  %s687_s19 = sadd.s32 4294967294, %s1009_s17   ;;  %s1009_s17 = sphi %s1046_s17, %s20_s17   ;;  %s1005_s16 = sphi %s1044_s16, %s1326_s16   ;;  %s1001_s15 = sphi %s1042_s15, %s1325_s15   ;;  %s997_s14 = sphi %s1040_s14, %s1324_s14   ;;  %s993_s13 = sphi %s1038_s13, %s1323_s13   ;;  %s989_s12 = sphi %s1036_s12, %s1322_s12  }
   0x8   : > { %s76_s20 = sadd.s32 1, %s997_s14  ;;  %p83_p0 = scmp.ne.s32.totalorder %s997_s14, %s993_s13 }
   0x9   : > { %p84_p1 = scmp.eq.s32.totalorder %s1009_s17, 0  ;;  %p89_p2 = scmp.ne.s32.totalorder %s993_s13, %s989_s12 }
   0xa   : > { %p1074_p3 = scmp.eq.s32.totalorder %s686_s18, 0  ;;  %p143_p4 = scmp.eq.s32.totalorder %s686_s18, 1 }
   0xb   : > { %p1078_p5 = por %p84_p1, %p83_p0  ;;  %p149_p6 = scmp.eq.s32.totalorder %s687_s19, 1 }
   0xc   : > { %s1305_s21 = scalar_select %p1074_p3, 1, 0 }
   0xd   : > { %p1084_p7 = por %p1074_p3, %p89_p2  ;;  %p1088_p8 = por %p143_p4, %p83_p0 }
   0xe   : > { %p1092_p9 = por %p149_p6, %p89_p2  ;;  %p688_p10 = scmp.ge.s32.totalorder %s1009_s17, 1 }
   0xf   : > { %s1307_s23 = scalar_select %p1084_p7, 1, 0 }
  0x10   : > { %s1308_s24 = scalar_select %p1088_p8, 1, 0 }
  0x11   : > { %s1309_s25 = scalar_select %p1092_p9, 1, 0 }
  0x12   : > { %p156_p11 = scmp.lt.s32.totalorder %s1009_s17, 3  ;;  %s1011_s27 = smov [#allocation3]  }
  0x13   : > { %s172_s28 = sshll.u32 %s1011_s27, 4  ;;  %p761_p1 = scmp.lt.s32.totalorder %s1009_s17, 2  ;;  %s173_s28 = int_to_ptr.vmem [resolvable:$true] %s172_s28 }
  0x14   : > { %p1099_p13 = pnand %p688_p10, %p156_p11  ;;  %s39_s4 = sadd.s32 1, %s1005_s16 }
  0x15   : > { %p1108_p4 = pnand %p761_p1, %p1078_p5  ;;  %p1119_p6 = scmp.ge.s32.totalorder %s39_s4, 2 }
  0x16   : > { %s1310_s26 = scalar_select %p1099_p13, 1, 0 }
  0x17   : > { %p748_p0 = pneg %p1099_p13  ;;  %s183_s6 = sand.u32 1, %s997_s14  }
  0x18   : > { %s1311_s29 = scalar_select %p1108_p4, 1, 0 }
  0x19   : > { %p1114_p2 = pnand %p748_p0, %p1074_p3  ;;  %s865_s9 = scalar_lea.hbm %s1295_s0, 128 }
  0x1a   : > { %s1313_s5 = scalar_select %p1119_p6, 1, 0 }
  0x1b   : > { %p866_p5 = scmp.ne.s32.totalorder %s1295_s0, %s865_s9  ;;  %p867_p10 = pneg %p1114_p2 }
  0x1c   : > { %p872_p0 = scmp.lt.u32.totalorder %s865_s9, %s1295_s0 }
  0x1d   : > { %p868_p11 = pnand %p867_p10, %p866_p5 }
  0x1f   : > { %p869_p1 = pneg %p868_p11 }
  0x21   : > { %p874_p12 = pnand %p872_p0, %p869_p1 }
  0x23   : > { %877 = shalt.err (!%p874_p12)
}
  0x24   : > { %s878_s22 = scalar_lea.vmem %s173_s28, 128  ;;  %p886_p3 = scmp.lt.s32.totalorder %s173_s28, %s173_s28 }
  0x25   : > { %p879_p9 = scmp.ne.s32.totalorder %s173_s28, %s878_s22  ;;  %p887_p13 = scmp.lt.s32.totalorder %s878_s22, %s878_s22 }
  0x27   : > { %p881_p8 = pnand %p879_p9, %p867_p10  ;;  %p888_p4 = por %p887_p13, %p886_p3 }
  0x29   : > { %p882_p7 = pneg %p881_p8 }
  0x2b   : > { %p889_p6 = pnand %p888_p4, %p882_p7 }
  0x2d   : > { %892 = shalt.err (!%p889_p6)
}
  0x2e   : > { %751 = dma.hbm_to_vmem [thread:$0]  (!%p1114_p2), %s1295_s0, 128, %s173_s28, [#allocation4]  }
  0x2f   : > { %p1314_p9 = scmp.ne.s32.totalorder %s1313_s5, 0  ;;  %s691_s8 = sshll.u32 %s183_s6, 8 }
  0x30   : > { %s738_s10 = sshll.u32 %s1005_s16, 12  ;;  %s187_s19 = scalar_lea.vmem [#allocation6], %s691_s8 }
  0x31   : > { %s1328_s4 = smov (%p1314_p9, %s39_s4), 0  ;;  %s1150_s18 = scalar_lea.hbm %s1296_s1, %s738_s10 }
  0x32   : > { %s69_s9 = ssub.s32 %s1005_s16, %s1328_s4  ;;  %s199_s22 = sshll.u32 %s187_s19, 4  ;;  %s1157_s22 = int_to_ptr.vmem [resolvable:$true] %s199_s22 }
  0x33   : > { %p74_p3 = scmp.eq.s32.totalorder %s69_s9, 0  ;;  %s1159_s5 = scalar_lea.sflag [#allocation7], %s183_s6 }
  0x34   : > { %s893_s27 = scalar_lea.hbm %s1150_s18, 4096  ;;  %p1315_p8 = scmp.ne.s32.totalorder %s1311_s29, 0 }
  0x35   : > { %s1155_s28 = scalar_select %p74_p3, %s997_s14, %s76_s20  }
  0x36   : > { %p894_p7 = scmp.ne.s32.totalorder %s1150_s18, %s893_s27  ;;  %p895_p12 = pneg %p1315_p8 }
  0x37   : > { %s898_s8 = scalar_lea.hbm %s1296_s1, 8192  ;;  %p899_p2 = scmp.lt.u32.totalorder %s1150_s18, %s1296_s1 }
  0x38   : > { %p896_p13 = pnand %p895_p12, %p894_p7  ;;  %p900_p6 = scmp.lt.u32.totalorder %s898_s8, %s893_s27 }
  0x39   : > { %p902_p10 = scmp.lt.u32.totalorder %s893_s27, %s1150_s18 }
  0x3a   : > { %p897_p4 = pneg %p896_p13  ;;  %p901_p5 = por %p900_p6, %p899_p2 }
  0x3c   : > { %p903_p11 = por %p902_p10, %p901_p5 }
  0x3e   : > { %p904_p1 = pnand %p903_p11, %p897_p4 }
  0x40   : > { %907 = shalt.err (!%p904_p1)
}
  0x41   : > { %s908_s20 = scalar_lea.vmem %s1157_s22, 4096  ;;  %s1012_s6 = smov [#allocation6]  }
  0x42   : > { %p909_p0 = scmp.ne.s32.totalorder %s1157_s22, %s908_s20  ;;  %s913_s11 = sshll.u32 %s1012_s6, 4  ;;  %s914_s11 = int_to_ptr.vmem [resolvable:$false] %s913_s11 }
  0x43   : > { %s915_s19 = scalar_lea.vmem %s914_s11, 8192  ;;  %p916_p7 = scmp.lt.s32.totalorder %s1157_s22, %s914_s11 }
  0x44   : > { %p911_p9 = pnand %p909_p0, %p895_p12  ;;  %p917_p13 = scmp.lt.s32.totalorder %s915_s19, %s908_s20 }
  0x46   : > { %p912_p3 = pneg %p911_p9  ;;  %p918_p2 = por %p917_p13, %p916_p7 }
  0x48   : > { %p919_p6 = pnand %p918_p2, %p912_p3 }
  0x4a   : > { %922 = shalt.err (!%p919_p6)
}
  0x4b   : > { %s1013_s27 = smov 128   ;;  %s1014_s7 = smov 8  }
  0x4c   : > { %755 = dma.hbm_to_vmem [thread:$0]  (!%p1315_p8), %s1150_s18, 4096, %s1157_s22, %s1159_s5, %s1013_s27, %s1013_s27, %s1014_s7  }
  0x4d   : > { %p1316_p12 = scmp.ne.s32.totalorder %s1310_s26, 0 }
  0x4e   : > { %p1317_p4 = scmp.ne.s32.totalorder (!%p1316_p12), %s1305_s21, 0 }
  0x4f   : > { %223 = sbr.rel (%p1316_p12) target bundleno = 385 (0x181), region = 32 }
  0x56   : > { %976 = dma.done.wait (%p1317_p4), [#allocation4], 128  }
  0x57   : > { %978 = vsyncadd (%p1317_p4), [#allocation4], 4294967168  ;;  %s1194_s9 = sand.u32 1, %s993_s13   ;;  %p1318_p8 = scmp.ne.s32.totalorder %s1307_s23, 0 }
  0x58   : > { %s696_s8 = sshll.u32 %s1194_s9, 8  ;;  %s230_s10 = scalar_lea.sflag [#allocation7], %s1194_s9 }
  0x59   : > { %s1198_s30 = scalar_lea.vmem [#allocation6], %s696_s8 }
  0x5a   : > { %980 = dma.done.wait (%p1318_p8), %s230_s10, 4096  }
  0x5b   : > { %982 = vsyncadd (%p1318_p8), %s230_s10, 4294963200  ;;  %v815_v0 = vld [vmem:[%s1198_s30 + $0x4] ss:$8 sps:$4 sm:$0xff]   ;;  %v817_v1 = vld [vmem:[%s1198_s30] ss:$8 sps:$4 sm:$0xff]   ;;  %p268_p5 = scmp.lt.s32.totalorder %s1001_s15, 1  ;;  %v537_v35 = vlaneseq }
  0x5c   : > { %485 = vmatprep.subr.bf16.mxu0 %v815_v0  ;;  %v818_v2 = vld [vmem:[%s1198_s30 + $0x14] ss:$8 sps:$4 sm:$0xff]   ;;  %v820_v3 = vld [vmem:[%s1198_s30 + $0x10] ss:$8 sps:$4 sm:$0xff]   ;;  %v821_v4 = vld [vmem:[%s1198_s30 + $0x24] ss:$8 sps:$4 sm:$0xff]  }
  0x5d   : > { %486 = vmatpush1.bf16.msra.mxu0 %v817_v1  ;;  %v823_v5 = vld [vmem:[%s1198_s30 + $0x20] ss:$8 sps:$4 sm:$0xff]   ;;  %v824_v6 = vld [vmem:[%s1198_s30 + $0x34] ss:$8 sps:$4 sm:$0xff]   ;;  %v826_v7 = vld [vmem:[%s1198_s30 + $0x30] ss:$8 sps:$4 sm:$0xff]  }
  0x5e   : > { %487 = vmatprep.subr.bf16.mxu0 %v818_v2  ;;  %v827_v8 = vld [vmem:[%s1198_s30 + $0x44] ss:$8 sps:$4 sm:$0xff]   ;;  %v829_v9 = vld [vmem:[%s1198_s30 + $0x40] ss:$8 sps:$4 sm:$0xff]   ;;  %v830_v10 = vld [vmem:[%s1198_s30 + $0x54] ss:$8 sps:$4 sm:$0xff]  }
  0x5f   : > { %v832_v11 = vld [vmem:[%s1198_s30 + $0x50] ss:$8 sps:$4 sm:$0xff]   ;;  %v833_v12 = vld [vmem:[%s1198_s30 + $0x64] ss:$8 sps:$4 sm:$0xff]   ;;  %v835_v15 = vld [vmem:[%s1198_s30 + $0x60] ss:$8 sps:$4 sm:$0xff]  }
  0x60   : > { %v285_v13 = vld [vmem:[#allocation3] sm:$0xff]  ;;  %v839_v18 = vld [vmem:[%s1198_s30 + $0x84] ss:$8 sps:$4 sm:$0xff]   ;;  %v841_v19 = vld [vmem:[%s1198_s30 + $0x80] ss:$8 sps:$4 sm:$0xff]   ;;  %s269_s21 = scalar_select %p268_p5, %s1001_s15, 1 }
  0x61   : > { %488 = vmatpush1.bf16.msra.mxu0 %v820_v3  ;;  %v700_v14 = vcombine.high %v285_v13, %v285_v13  ;;  %v836_v16 = vld [vmem:[%s1198_s30 + $0x74] ss:$8 sps:$4 sm:$0xff]   ;;  %v838_v17 = vld [vmem:[%s1198_s30 + $0x70] ss:$8 sps:$4 sm:$0xff]   ;;  %v845_v22 = vld [vmem:[%s1198_s30 + $0xa4] ss:$8 sps:$4 sm:$0xff]   ;;  %v699_v34 = vcombine.low %v285_v13, %v285_v13 }
  0x62   : > { %489 = vmatprep.subr.bf16.mxu0 %v821_v4  ;;  %v842_v20 = vld [vmem:[%s1198_s30 + $0x94] ss:$8 sps:$4 sm:$0xff]   ;;  %v844_v21 = vld [vmem:[%s1198_s30 + $0x90] ss:$8 sps:$4 sm:$0xff]   ;;  %v847_v23 = vld [vmem:[%s1198_s30 + $0xa0] ss:$8 sps:$4 sm:$0xff]  }
  0x63   : > { %517 = vmatprep.mubr.bf16.mxu0 %v700_v14  ;;  %v848_v24 = vld [vmem:[%s1198_s30 + $0xb4] ss:$8 sps:$4 sm:$0xff]   ;;  %v850_v25 = vld [vmem:[%s1198_s30 + $0xb0] ss:$8 sps:$4 sm:$0xff]   ;;  %v851_v26 = vld [vmem:[%s1198_s30 + $0xc4] ss:$8 sps:$4 sm:$0xff]  }
  0x64   : > { %v853_v27 = vld [vmem:[%s1198_s30 + $0xc0] ss:$8 sps:$4 sm:$0xff]   ;;  %v854_v28 = vld [vmem:[%s1198_s30 + $0xd4] ss:$8 sps:$4 sm:$0xff]   ;;  %v856_v29 = vld [vmem:[%s1198_s30 + $0xd0] ss:$8 sps:$4 sm:$0xff]  }
  0x65   : > { %490 = vmatpush1.bf16.msra.mxu0 %v823_v5  ;;  %v857_v30 = vld [vmem:[%s1198_s30 + $0xe4] ss:$8 sps:$4 sm:$0xff]   ;;  %v859_v31 = vld [vmem:[%s1198_s30 + $0xe0] ss:$8 sps:$4 sm:$0xff]   ;;  %v860_v32 = vld [vmem:[%s1198_s30 + $0xf4] ss:$8 sps:$4 sm:$0xff]  }
  0x66   : > { %491 = vmatprep.subr.bf16.mxu0 %v824_v6  ;;  %v862_v33 = vld [vmem:[%s1198_s30 + $0xf0] ss:$8 sps:$4 sm:$0xff]   ;;  %s698_s23 = sshll.u32 %s269_s21, 1  ;;  %v538_v36 = vshrl.u32 %v537_v35, 7  ;;  %s697_s22 = sshll.u32 %s1194_s9, 4 }
  0x67   : > { %s274_s18 = scalar_lea.vmem %s1297_s2, %s698_s23  ;;  %s739_s5 = sshll.u32 %s1001_s15, 8 }
  0x68   : > { %v539_v37 = vsub.s32 0, %v538_v36  ;;  %v535_v38 = vld [vmem:[%s274_s18] sm:$0x3]  ;;  %v543_v39 = vsub.s32 1, %v538_v36  ;;  %s263_s20 = scalar_lea.vmem [#allocation8], %s697_s22  ;;  %s1246_s27 = scalar_lea.hbm %s1298_s3, %s739_s5 }
  0x69   : > { %492 = vmatpush1.bf16.msra.mxu0 %v826_v7  ;;  %s568_s6 = sshll.u32 %s263_s20, 4  ;;  %s552_s15 = scalar_lea.sflag [#allocation5], %s1194_s9  ;;  %s1248_s6 = int_to_ptr.vmem [resolvable:$true] %s568_s6 }
  0x6a   : > { %493 = vmatprep.subr.bf16.mxu0 %v827_v8  ;;  %v540_v40 = vrot.slane %v535_v38, %v539_v37  ;;  %v544_v41 = vrot.slane %v535_v38, %v543_v39  ;;  %s923_s7 = scalar_lea.vmem %s1248_s6, 256  ;;  %p1319_p11 = scmp.ne.s32.totalorder %s1308_s24, 0 }
  0x6b   : > { %p924_p10 = scmp.ne.s32.totalorder %s1248_s6, %s923_s7  ;;  %s1015_s8 = smov [#allocation8]  }
  0x6c   : > { %s927_s10 = sshll.u32 %s1015_s8, 4  ;;  %s928_s10 = int_to_ptr.vmem [resolvable:$false] %s927_s10 }
  0x6d   : > { %494 = vmatpush1.bf16.msra.mxu0 %v829_v9  ;;  %p925_p1 = pnand %p924_p10, %p1319_p11  ;;  %s929_s30 = scalar_lea.vmem %s928_s10, 512 }
  0x6e   : > { %495 = vmatprep.subr.bf16.mxu0 %v830_v10  ;;  %p930_p9 = scmp.lt.s32.totalorder %s1248_s6, %s928_s10  ;;  %p931_p3 = scmp.lt.s32.totalorder %s929_s30, %s923_s7 }
  0x6f   : > { %p926_p0 = pneg %p925_p1 }
  0x70   : > { %p932_p7 = por %p931_p3, %p930_p9 }
  0x71   : > { %496 = vmatpush1.bf16.msra.mxu0 %v832_v11 }
  0x72   : > { %497 = vmatprep.subr.bf16.mxu0 %v833_v12  ;;  %p933_p13 = pnand %p932_p7, %p926_p0 }
  0x75   : > { %498 = vmatpush1.bf16.msra.mxu0 %v835_v15 }
  0x76   : > { %499 = vmatprep.subr.bf16.mxu0 %v836_v16 }
  0x79   : > { %500 = vmatpush1.bf16.msra.mxu0 %v838_v17 }
  0x7a   : > { %501 = vmatprep.subr.bf16.mxu0 %v839_v18 }
  0x7d   : > { %502 = vmatpush1.bf16.msra.mxu0 %v841_v19 }
  0x7e   : > { %503 = vmatprep.subr.bf16.mxu0 %v842_v20 }
  0x81   : > { %504 = vmatpush1.bf16.msra.mxu0 %v844_v21 }
  0x82   : > { %505 = vmatprep.subr.bf16.mxu0 %v845_v22 }
  0x85   : > { %506 = vmatpush1.bf16.msra.mxu0 %v847_v23 }
  0x86   : > { %507 = vmatprep.subr.bf16.mxu0 %v848_v24 }
  0x89   : > { %508 = vmatpush1.bf16.msra.mxu0 %v850_v25 }
  0x8a   : > { %509 = vmatprep.subr.bf16.mxu0 %v851_v26 }
  0x8d   : > { %510 = vmatpush1.bf16.msra.mxu0 %v853_v27 }
  0x8e   : > { %511 = vmatprep.subr.bf16.mxu0 %v854_v28 }
  0x91   : > { %512 = vmatpush1.bf16.msra.mxu0 %v856_v29 }
  0x92   : > { %513 = vmatprep.subr.bf16.mxu0 %v857_v30 }
  0x95   : > { %514 = vmatpush1.bf16.msra.mxu0 %v859_v31 }
  0x96   : > { %515 = vmatprep.subr.bf16.mxu0 %v860_v32 }
  0x99   : > { %516 = vmatpush1.bf16.msra.mxu0 %v862_v33 }
  0x9c   : > { %518 = vmatmul.mubr.bf16.vlgmr.msra.gmra.mrb[0].mxu0 %v699_v34 }
 0x16f   : > { %v519_v42 = vpop.f32.mrb[0].mxu0 }
 0x170   : > { %v547_v43 = vadd.f32 %v540_v40, %v519_v42  ;;  %v521_v44 = vpop.f32.mrb[1].mxu0 }
 0x171   : > { %v548_v45 = vadd.f32 %v544_v41, %v521_v44  ;;  %v523_v46 = vpop.f32.mrb[2].mxu0 }
 0x172   : > { %549 = vst [vmem:[%s263_s20] sm:$0xff] %v547_v43  ;;  %v524_v47 = vpop.f32.mrb[3].mxu0 }
 0x173   : > { %550 = vst [vmem:[%s263_s20 + $0x8] sm:$0xff] %v548_v45 }
 0x174   : > { %936 = shalt.err (!%p933_p13)
}
 0x175   : > { %s937_s9 = scalar_lea.hbm %s1246_s27, 256  ;;  %s941_s26 = scalar_lea.hbm %s1298_s3, 512 }
 0x176   : > { %p938_p2 = scmp.ne.s32.totalorder %s1246_s27, %s937_s9  ;;  %p942_p4 = scmp.lt.u32.totalorder %s1246_s27, %s1298_s3 }
 0x177   : > { %p943_p8 = scmp.lt.u32.totalorder %s941_s26, %s937_s9  ;;  %p945_p10 = scmp.lt.u32.totalorder %s937_s9, %s1246_s27 }
 0x178   : > { %p939_p6 = pnand %p938_p2, %p1319_p11 }
 0x179   : > { %p944_p5 = por %p943_p8, %p942_p4 }
 0x17a   : > { %p940_p12 = pneg %p939_p6 }
 0x17b   : > { %p946_p1 = por %p945_p10, %p944_p5 }
 0x17d   : > { %p947_p0 = pnand %p946_p1, %p940_p12 }
 0x17f   : > { %950 = shalt.err (!%p947_p0)
}
 0x180   : > { %746 = dma.vmem_to_hbm [thread:$0]  (%p1319_p11), %s1248_s6, 256, %s1246_s27, %s552_s15  }
 0x181 PF: > { %s580_s22 = sand.u32 1, %s989_s12   ;;  %p1320_p9 = scmp.ne.s32.totalorder %s1309_s25, 0 }
 0x182   : > { %p1321_p3 = scmp.ge.s32.totalorder %s1009_s17, 2  ;;  %s581_s5 = scalar_lea.sflag [#allocation5], %s580_s22 }
 0x184   : > { %p757_p7 = pnand %p1321_p3, %p1320_p9 }
 0x186   : > { %984 = dma.done.wait (!%p757_p7), %s581_s5, 256  }
 0x187   : > { %986 = vsyncadd (!%p757_p7), %s581_s5, 4294967040  ;;  %s20_s17 = sadd.s32 1, %s1009_s17   ;;  %s1322_s12 = smov %s993_s13 }
 0x188   : > { %p17_p13 = scmp.ge.s32.totalorder %s20_s17, 4   ;;  %s1323_s13 = smov %s997_s14 }
 0x189   : > { %s1324_s14 = smov %s1155_s28  ;;  %s1325_s15 = smov %s1005_s16 }
 0x18a   : > { %s1326_s16 = smov %s1328_s4  ;;  %19 = sbr.rel (!%p17_p13) target bundleno = 7 (0x7), region = 94 }
 0x191   :  { %586 = vsyncpa [#allocation4], 1 }
 0x192   :  { %588 = vsyncpa [#allocation4 + $0x1], 1 }
 0x193   :  { %589 = vsyncpa [#allocation7], 1 }
 0x194   :  { %591 = vsyncpa [#allocation7 + $0x1], 1 }
 0x195   :  { %592 = vsyncpa [#allocation5], 1 }
 0x196   :  { %594 = vsyncpa [#allocation5 + $0x1], 1 }

</bundles_post_ra>
